<compile_context>
chip_gen: v7x
topology: tpu7x:2x2x1
jax: 0.10.0
libtpu: 0.0.40
codegen_flags: <defaults>
</compile_context>

<pallas_src>
import functools

import jax
import jax.numpy as jnp
from jax import lax
from jax.experimental import pallas as pl
from jax.experimental.pallas import tpu as pltpu

_BN_EPS = 1e-5


def _linear_relu_stats_kernel(xt_ref, w_ref, bias_ref, gb_ref,
                              y_ref, scale_ref, shift_ref,
                              s1_ref, s2_ref,
                              *, true_b: int, block_b: int):
    i = pl.program_id(0)

    @pl.when(i == 0)
    def _init():
        s1_ref[...] = jnp.zeros_like(s1_ref)
        s2_ref[...] = jnp.zeros_like(s2_ref)

    # Linear, feature-major: y^T = W @ x^T -> (out_dim, block_b), batch on
    # lanes.  Operands arrive pre-cast to bf16 (MXU-native); accumulate f32.
    y = jnp.dot(w_ref[...], xt_ref[...], preferred_element_type=jnp.float32)
    y = y + bias_ref[...]            # (out_dim, 1) column broadcast over lanes
    y = jnp.maximum(y, 0.0)          # ReLU
    y_ref[...] = y                   # lane-dense (block_b-lane) store

    # One-pass batch statistics; mask zero-padded batch columns out of sums.
    col = lax.broadcasted_iota(jnp.int32, (1, block_b), 1) + i * block_b
    valid = col < true_b
    ym = jnp.where(valid, y, 0.0)
    s1_ref[...] += jnp.sum(ym, axis=1, keepdims=True)
    s2_ref[...] += jnp.sum(ym * ym, axis=1, keepdims=True)

    @pl.when(i == pl.num_programs(0) - 1)
    def _finalize():
        inv_b = 1.0 / true_b
        mean = s1_ref[...] * inv_b
        # One-pass variance; clamp rounding/cancellation noise.
        # TODO(synk): switch to shifted/two-pass variance if activations grow
        # large enough that mean^2 >> var (cancellation risk).
        var = jnp.maximum(s2_ref[...] * inv_b - mean * mean, 0.0)
        gamma = gb_ref[:, 0:1]
        beta = gb_ref[:, 1:2]
        scale = gamma * lax.rsqrt(var + _BN_EPS)
        scale_ref[...] = scale
        shift_ref[...] = beta - mean * scale


def _normalize_kernel(y_ref, scale_ref, shift_ref, o_ref):
    # Purely HBM-bandwidth-bound lane-dense normalize: out = y*scale + shift.
    o_ref[...] = y_ref[...] * scale_ref[...] + shift_ref[...]


def dense_block(x, w, b, gamma, beta, *, block_b: int = 512):
    """DenseBlock forward: Linear -> ReLU -> BatchNorm1d (training stats).

    x: (B, in_dim); w: (out_dim, in_dim) torch layout; b/gamma/beta: (out_dim,).
    Returns (B, out_dim) float32.
    """
    B, in_dim = x.shape
    out_dim = w.shape[0]

    # Batch tiling: lanes are 128-wide; >=512-row tiles for the scaled case.
    block_b = min(block_b, max(128, pl.cdiv(B, 128) * 128))
    b_pad = pl.cdiv(B, block_b) * block_b
    nb = b_pad // block_b

    # Trace-time layout plumbing (outside the kernel, fused by XLA):
    #  * feature-major x^T so the batch axis lands on the lane dimension,
    #  * bf16 MXU operands (cast fused with the same pass as the transpose),
    #  * per-feature params presented as (out_dim, k) columns.
    xt = jnp.pad(x, ((0, b_pad - B), (0, 0))).T.astype(jnp.bfloat16)  # (in, b_pad)
    w_bf = w.astype(jnp.bfloat16)                                     # (out, in)
    bias_col = b.reshape(out_dim, 1).astype(jnp.float32)              # (out, 1)
    gb = jnp.stack([gamma.reshape(out_dim), beta.reshape(out_dim)],
                   axis=1).astype(jnp.float32)                        # (out, 2)

    kernel1 = functools.partial(_linear_relu_stats_kernel,
                                true_b=B, block_b=block_b)

    y_fm, scale, shift = pl.pallas_call(
        kernel1,
        out_shape=(
            jax.ShapeDtypeStruct((out_dim, b_pad), jnp.float32),  # y^T (pre-BN)
            jax.ShapeDtypeStruct((out_dim, 1), jnp.float32),      # folded scale
            jax.ShapeDtypeStruct((out_dim, 1), jnp.float32),      # folded shift
        ),
        grid_spec=pltpu.PrefetchScalarGridSpec(
            num_scalar_prefetch=0,
            grid=(nb,),
            in_specs=[
                pl.BlockSpec((in_dim, block_b), lambda i: (0, i)),
                pl.BlockSpec((out_dim, in_dim), lambda i: (0, 0)),
                pl.BlockSpec((out_dim, 1), lambda i: (0, 0)),
                pl.BlockSpec((out_dim, 2), lambda i: (0, 0)),
            ],
            out_specs=(
                pl.BlockSpec((out_dim, block_b), lambda i: (0, i)),
                pl.BlockSpec((out_dim, 1), lambda i: (0, 0)),
                pl.BlockSpec((out_dim, 1), lambda i: (0, 0)),
            ),
            scratch_shapes=[
                pltpu.VMEM((out_dim, 1), jnp.float32),  # s1 accumulator
                pltpu.VMEM((out_dim, 1), jnp.float32),  # s2 accumulator
            ],
        ),
        compiler_params=pltpu.CompilerParams(
            # Batch axis doubles as the BN-stats reduction -> sequential.
            dimension_semantics=("arbitrary",),
        ),
    )(xt, w_bf, bias_col, gb)

    out_fm = pl.pallas_call(
        _normalize_kernel,
        out_shape=jax.ShapeDtypeStruct((out_dim, b_pad), jnp.float32),
        grid_spec=pltpu.PrefetchScalarGridSpec(
            num_scalar_prefetch=0,
            grid=(nb,),
            in_specs=[
                pl.BlockSpec((out_dim, block_b), lambda i: (0, i)),
                pl.BlockSpec((out_dim, 1), lambda i: (0, 0)),
                pl.BlockSpec((out_dim, 1), lambda i: (0, 0)),
            ],
            out_specs=pl.BlockSpec((out_dim, block_b), lambda i: (0, i)),
        ),
        compiler_params=pltpu.CompilerParams(
            # Independent blocks -> megacore-shardable on v7x.
            dimension_semantics=("parallel",),
        ),
    )(y_fm, scale, shift)

    # Back to torch layout (B, out_dim).  In a fused multi-layer stack keep the
    # feature-major layout end-to-end and drop this transpose.
    return out_fm[:, :B].T


if __name__ == "__main__":
    key = jax.random.PRNGKey(0)
    # Non-multiple-of-128 batch exercises the partial-block stats masking.
    batch, input_dim, output_dim = 200, 32, 16
    k_x, k_w, k_b = jax.random.split(key, 3)

    # Deterministic parameter init (shapes from DenseBlock.__init__):
    #  - linear.weight: (output_dim, input_dim), xavier-uniform-ish
    #  - linear.bias:   small nonzero values (exercises bias + mask paths)
    #  - batch_norm.weight (gamma) = 1, batch_norm.bias (beta) = 0
    limit = (6.0 / (input_dim + output_dim)) ** 0.5
    w = jax.random.uniform(k_w, (output_dim, input_dim), jnp.float32,
                           minval=-limit, maxval=limit)
    b = jax.random.uniform(k_b, (output_dim,), jnp.float32,
                           minval=-0.1, maxval=0.1)
    gamma = jnp.ones((output_dim,), jnp.float32)
    beta = jnp.zeros((output_dim,), jnp.float32)
    x = jax.random.normal(k_x, (batch, input_dim), jnp.float32)

    # block_b=128 -> grid of 2 batch blocks (exercises accumulate + finalize).
    out = dense_block(x, w, b, gamma, beta, block_b=128)
    out = jax.block_until_ready(out)
    assert out.shape == (batch, output_dim)

    # Pure-JAX f32 reference of the torch forward semantics:
    # Linear -> ReLU -> BatchNorm1d (training mode, biased variance).
    y_ref = jnp.maximum(x @ w.T + b[None, :], 0.0)
    m = jnp.mean(y_ref, axis=0, keepdims=True)
    v = jnp.mean((y_ref - m) ** 2, axis=0, keepdims=True)
    ref = (y_ref - m) * jax.lax.rsqrt(v + _BN_EPS) * gamma[None, :] + beta[None, :]

    # Kernel uses bf16 MXU operands (f32 accumulation) -> bf16-level tolerance.
    assert jnp.allclose(out, ref, atol=3e-2, rtol=3e-2), "mismatch vs reference"

    print("KERNEL_OK")
</pallas_src>

<mosaic_0001>
module attributes {stable_mosaic.version = 11 : i64} {
  func.func @_linear_relu_stats_kernel(%arg0: i32, %arg1: memref<32x128xbf16, #tpu.memory_space<vmem>>, %arg2: memref<16x32xbf16, #tpu.memory_space<vmem>>, %arg3: memref<16x1xf32, #tpu.memory_space<vmem>>, %arg4: memref<16x2xf32, #tpu.memory_space<vmem>>, %arg5: memref<16x128xf32, #tpu.memory_space<vmem>>, %arg6: memref<16x1xf32, #tpu.memory_space<vmem>>, %arg7: memref<16x1xf32, #tpu.memory_space<vmem>>, %arg8: memref<16x1xf32, #tpu.memory_space<vmem>>, %arg9: memref<16x1xf32, #tpu.memory_space<vmem>>) attributes {dimension_semantics = [#tpu.dimension_semantics<arbitrary>], iteration_bounds = array<i64: 2>, scalar_prefetch = 0 : i64, scratch_operands = 2 : i64, tpu.core_type = #tpu.core_type<tc>, window_params = [{transform_indices = @transform_0, window_bounds = array<i64: 32, 128>}, {pipeline_mode = #tpu.pipeline_mode<synchronous>, transform_indices = @transform_1, window_bounds = array<i64: 16, 32>}, {pipeline_mode = #tpu.pipeline_mode<synchronous>, transform_indices = @transform_2, window_bounds = array<i64: 16, 1>}, {pipeline_mode = #tpu.pipeline_mode<synchronous>, transform_indices = @transform_3, window_bounds = array<i64: 16, 2>}, {transform_indices = @transform_4, window_bounds = array<i64: 16, 128>}, {pipeline_mode = #tpu.pipeline_mode<synchronous>, transform_indices = @transform_5, window_bounds = array<i64: 16, 1>}, {pipeline_mode = #tpu.pipeline_mode<synchronous>, transform_indices = @transform_6, window_bounds = array<i64: 16, 1>}]} {
    %c0_i32 = arith.constant 0 : i32
    %0 = arith.cmpi eq, %arg0, %c0_i32 : i32
    %1 = arith.extui %0 : i1 to i32
    %c0_i32_0 = arith.constant 0 : i32
    %2 = arith.cmpi ne, %1, %c0_i32_0 : i32
    scf.if %2 {
      %cst_21 = arith.constant 0.000000e+00 : f32
      %36 = vector.broadcast %cst_21 : f32 to vector<16x1xf32>
      %c0_22 = arith.constant 0 : index
      %c0_23 = arith.constant 0 : index
      %37 = vector.load %arg8[%c0_22, %c0_23] : memref<16x1xf32, #tpu.memory_space<vmem>>, vector<16x1xf32>
      tpu.vector_store %arg8[%c0_22, %c0_23], %36 {strides = array<i32>} : memref<16x1xf32, #tpu.memory_space<vmem>>, vector<16x1xf32>,
      %cst_24 = arith.constant 0.000000e+00 : f32
      %38 = vector.broadcast %cst_24 : f32 to vector<16x1xf32>
      %c0_25 = arith.constant 0 : index
      %c0_26 = arith.constant 0 : index
      %39 = vector.load %arg9[%c0_25, %c0_26] : memref<16x1xf32, #tpu.memory_space<vmem>>, vector<16x1xf32>
      tpu.vector_store %arg9[%c0_25, %c0_26], %38 {strides = array<i32>} : memref<16x1xf32, #tpu.memory_space<vmem>>, vector<16x1xf32>,
    } else {
    }
    %c0 = arith.constant 0 : index
    %c0_1 = arith.constant 0 : index
    %3 = vector.load %arg2[%c0, %c0_1] : memref<16x32xbf16, #tpu.memory_space<vmem>>, vector<16x32xbf16>
    %c0_2 = arith.constant 0 : index
    %c0_3 = arith.constant 0 : index
    %4 = vector.load %arg1[%c0_2, %c0_3] : memref<32x128xbf16, #tpu.memory_space<vmem>>, vector<32x128xbf16>
    %cst = arith.constant dense<0.000000e+00> : vector<16x128xf32>
    %5 = tpu.matmul %3, %4, %cst {dimension_numbers = #tpu.dot_dimension_numbers<[1], [0], [0], [1], [0, 0, 1, 1], [], []>} : vector<16x32xbf16>, vector<32x128xbf16>, vector<16x128xf32> -> vector<16x128xf32>
    %c0_4 = arith.constant 0 : index
    %c0_5 = arith.constant 0 : index
    %6 = vector.load %arg3[%c0_4, %c0_5] : memref<16x1xf32, #tpu.memory_space<vmem>>, vector<16x1xf32>
    %7 = vector.broadcast %6 : vector<16x1xf32> to vector<16x128xf32>
    %8 = arith.addf %5, %7 : vector<16x128xf32>
    %cst_6 = arith.constant 0.000000e+00 : f32
    %9 = vector.broadcast %cst_6 : f32 to vector<16x128xf32>
    %10 = arith.maximumf %8, %9 : vector<16x128xf32>
    %c0_7 = arith.constant 0 : index
    %c0_8 = arith.constant 0 : index
    %11 = vector.load %arg5[%c0_7, %c0_8] : memref<16x128xf32, #tpu.memory_space<vmem>>, vector<16x128xf32>
    tpu.vector_store %arg5[%c0_7, %c0_8], %10 {strides = array<i32>} : memref<16x128xf32, #tpu.memory_space<vmem>>, vector<16x128xf32>,
    %12 = tpu.iota {dimensions = array<i32: 1>} : vector<1x128xi32>
    %c128_i32 = arith.constant 128 : i32
    %13 = arith.muli %arg0, %c128_i32 : i32
    %14 = vector.broadcast %13 : i32 to vector<1x128xi32>
    %15 = arith.addi %12, %14 : vector<1x128xi32>
    %c200_i32 = arith.constant 200 : i32
    %16 = vector.broadcast %c200_i32 : i32 to vector<1x128xi32>
    %17 = arith.cmpi slt, %15, %16 : vector<1x128xi32>
    %cst_9 = arith.constant 0.000000e+00 : f32
    %18 = vector.shape_cast %17 : vector<1x128xi1> to vector<1x128xi1>
    %19 = vector.broadcast %18 : vector<1x128xi1> to vector<16x128xi1>
    %20 = vector.broadcast %cst_9 : f32 to vector<16x128xf32>
    %21 = arith.select %19, %10, %20 : vector<16x128xi1>, vector<16x128xf32>
    %c0_10 = arith.constant 0 : index
    %c0_11 = arith.constant 0 : index
    %22 = vector.load %arg8[%c0_10, %c0_11] : memref<16x1xf32, #tpu.memory_space<vmem>>, vector<16x1xf32>
    %cst_12 = arith.constant dense<0.000000e+00> : vector<16xf32>
    %23 = vector.multi_reduction <add>, %21, %cst_12 [1] : vector<16x128xf32> to vector<16xf32>
    %24 = vector.shape_cast %23 : vector<16xf32> to vector<16x1xf32>
    %25 = arith.addf %22, %24 : vector<16x1xf32>
    %c0_13 = arith.constant 0 : index
    %c0_14 = arith.constant 0 : index
    %26 = vector.load %arg8[%c0_13, %c0_14] : memref<16x1xf32, #tpu.memory_space<vmem>>, vector<16x1xf32>
    tpu.vector_store %arg8[%c0_13, %c0_14], %25 {strides = array<i32>} : memref<16x1xf32, #tpu.memory_space<vmem>>, vector<16x1xf32>,
    %c0_15 = arith.constant 0 : index
    %c0_16 = arith.constant 0 : index
    %27 = vector.load %arg9[%c0_15, %c0_16] : memref<16x1xf32, #tpu.memory_space<vmem>>, vector<16x1xf32>
    %28 = arith.mulf %21, %21 : vector<16x128xf32>
    %cst_17 = arith.constant dense<0.000000e+00> : vector<16xf32>
    %29 = vector.multi_reduction <add>, %28, %cst_17 [1] : vector<16x128xf32> to vector<16xf32>
    %30 = vector.shape_cast %29 : vector<16xf32> to vector<16x1xf32>
    %31 = arith.addf %27, %30 : vector<16x1xf32>
    %c0_18 = arith.constant 0 : index
    %c0_19 = arith.constant 0 : index
    %32 = vector.load %arg9[%c0_18, %c0_19] : memref<16x1xf32, #tpu.memory_space<vmem>>, vector<16x1xf32>
    tpu.vector_store %arg9[%c0_18, %c0_19], %31 {strides = array<i32>} : memref<16x1xf32, #tpu.memory_space<vmem>>, vector<16x1xf32>,
    %c1_i32 = arith.constant 1 : i32
    %33 = arith.cmpi eq, %arg0, %c1_i32 : i32
    %34 = arith.extui %33 : i1 to i32
    %c0_i32_20 = arith.constant 0 : i32
    %35 = arith.cmpi ne, %34, %c0_i32_20 : i32
    scf.if %35 {
      %c0_21 = arith.constant 0 : index
      %c0_22 = arith.constant 0 : index
      %36 = vector.load %arg8[%c0_21, %c0_22] : memref<16x1xf32, #tpu.memory_space<vmem>>, vector<16x1xf32>
      %cst_23 = arith.constant 5.000000e-03 : f32
      %37 = vector.broadcast %cst_23 : f32 to vector<16x1xf32>
      %38 = arith.mulf %36, %37 : vector<16x1xf32>
      %c0_24 = arith.constant 0 : index
      %c0_25 = arith.constant 0 : index
      %39 = vector.load %arg9[%c0_24, %c0_25] : memref<16x1xf32, #tpu.memory_space<vmem>>, vector<16x1xf32>
      %cst_26 = arith.constant 5.000000e-03 : f32
      %40 = vector.broadcast %cst_26 : f32 to vector<16x1xf32>
      %41 = arith.mulf %39, %40 : vector<16x1xf32>
      %42 = arith.mulf %38, %38 : vector<16x1xf32>
      %43 = arith.subf %41, %42 : vector<16x1xf32>
      %cst_27 = arith.constant 0.000000e+00 : f32
      %44 = vector.broadcast %cst_27 : f32 to vector<16x1xf32>
      %45 = arith.maximumf %43, %44 : vector<16x1xf32>
      %c0_28 = arith.constant 0 : index
      %c0_29 = arith.constant 0 : index
      %46 = vector.load %arg4[%c0_28, %c0_29] : memref<16x2xf32, #tpu.memory_space<vmem>>, vector<16x1xf32>
      %c0_30 = arith.constant 0 : index
      %c1 = arith.constant 1 : index
      %47 = vector.load %arg4[%c0_30, %c1] : memref<16x2xf32, #tpu.memory_space<vmem>>, vector<16x1xf32>
      %cst_31 = arith.constant 9.99999974E-6 : f32
      %48 = vector.broadcast %cst_31 : f32 to vector<16x1xf32>
      %49 = arith.addf %45, %48 : vector<16x1xf32>
      %50 = math.rsqrt %49 : vector<16x1xf32>
      %51 = arith.mulf %46, %50 : vector<16x1xf32>
      %c0_32 = arith.constant 0 : index
      %c0_33 = arith.constant 0 : index
      %52 = vector.load %arg6[%c0_32, %c0_33] : memref<16x1xf32, #tpu.memory_space<vmem>>, vector<16x1xf32>
      tpu.vector_store %arg6[%c0_32, %c0_33], %51 {strides = array<i32>} : memref<16x1xf32, #tpu.memory_space<vmem>>, vector<16x1xf32>,
      %53 = arith.mulf %38, %51 : vector<16x1xf32>
      %54 = arith.subf %47, %53 : vector<16x1xf32>
      %c0_34 = arith.constant 0 : index
      %c0_35 = arith.constant 0 : index
      %55 = vector.load %arg7[%c0_34, %c0_35] : memref<16x1xf32, #tpu.memory_space<vmem>>, vector<16x1xf32>
      tpu.vector_store %arg7[%c0_34, %c0_35], %54 {strides = array<i32>} : memref<16x1xf32, #tpu.memory_space<vmem>>, vector<16x1xf32>,
    } else {
    }
    return
  }
  func.func @transform_0(%arg0: i32) -> (i32, i32) {
    %c0_i32 = arith.constant 0 : i32
    %c0_i32_0 = arith.constant 0 : i32
    return %c0_i32, %arg0 : i32, i32
  }
  func.func @transform_1(%arg0: i32) -> (i32, i32) {
    %c0_i32 = arith.constant 0 : i32
    %c0_i32_0 = arith.constant 0 : i32
    %c0_i32_1 = arith.constant 0 : i32
    return %c0_i32, %c0_i32_0 : i32, i32
  }
  func.func @transform_2(%arg0: i32) -> (i32, i32) {
    %c0_i32 = arith.constant 0 : i32
    %c0_i32_0 = arith.constant 0 : i32
    %c0_i32_1 = arith.constant 0 : i32
    return %c0_i32, %c0_i32_0 : i32, i32
  }
  func.func @transform_3(%arg0: i32) -> (i32, i32) {
    %c0_i32 = arith.constant 0 : i32
    %c0_i32_0 = arith.constant 0 : i32
    %c0_i32_1 = arith.constant 0 : i32
    return %c0_i32, %c0_i32_0 : i32, i32
  }
  func.func @transform_4(%arg0: i32) -> (i32, i32) {
    %c0_i32 = arith.constant 0 : i32
    %c0_i32_0 = arith.constant 0 : i32
    return %c0_i32, %arg0 : i32, i32
  }
  func.func @transform_5(%arg0: i32) -> (i32, i32) {
    %c0_i32 = arith.constant 0 : i32
    %c0_i32_0 = arith.constant 0 : i32
    %c0_i32_1 = arith.constant 0 : i32
    return %c0_i32, %c0_i32_0 : i32, i32
  }
  func.func @transform_6(%arg0: i32) -> (i32, i32) {
    %c0_i32 = arith.constant 0 : i32
    %c0_i32_0 = arith.constant 0 : i32
    %c0_i32_1 = arith.constant 0 : i32
    return %c0_i32, %c0_i32_0 : i32, i32
  }
}

</mosaic_0001>

<bundles_post_ra>
// kernel: tpu_custom_call.1
= control target key start
LH: loop header
LB: loop body
LE: loop exit
PB: predicated region body
PF: predicated region fallthrough
CT: control target
= control target key end

     0   :  { %12 = vsyncpa [#allocation6], 0  ;;  %s1038_s0 = inlined_call_operand.vmem [shape: bf16[32,256], index: 0, kind: input, shape index: {}]   ;;  %s1039_s1 = inlined_call_operand.hbm [shape: bf16[16,32], index: 1, kind: input, shape index: {}]   ;;  %s1040_s2 = inlined_call_operand.vmem [shape: f32[16,1], index: 2, kind: input, shape index: {}]   ;;  %s1041_s3 = inlined_call_operand.vmem [shape: f32[16,2], index: 3, kind: input, shape index: {}]   ;;  %s1042_s4 = inlined_call_operand.hbm [shape: f32[16,256], index: 4, kind: output, shape index: {0}]   ;;  %s1043_s5 = inlined_call_operand.vmem [shape: f32[16,1], index: 5, kind: output, shape index: {1}]   ;;  %s1044_s6 = inlined_call_operand.vmem [shape: f32[16,1], index: 6, kind: output, shape index: {2}]  }
   0x1   :  { %13 = vsyncpa [#allocation7], 0 }
   0x2   :  { %15 = vsyncpa [#allocation7 + $0x1], 0  ;;  %s840_s21 = smov 0   ;;  %s842_s22 = smov 0  }
   0x3   :  { %s844_s23 = smov 0   ;;  %s846_s24 = smov 0  }
   0x4 LB: > { %s861_s25 = sadd.s32 4294967295, %s790_s24   ;;  %s595_s26 = sadd.s32 4294967294, %s790_s24   ;;  %s790_s24 = sphi %s846_s24, %s1063_s24   ;;  %s786_s23 = sphi %s844_s23, %s1062_s23   ;;  %s782_s22 = sphi %s842_s22, %s1061_s22   ;;  %s778_s21 = sphi %s840_s21, %s1060_s21  }
   0x5   : > { %s865_s27 = sadd.s32 1, %s790_s24   ;;  %s28_s28 = sadd.s32 1, %s786_s23 }
   0x6   : > { %s25_s29 = ssub.s32 %s790_s24, %s865_s27  ;;  %p35_p0 = scmp.ne.s32.totalorder %s786_s23, %s782_s22 }
   0x7   : > { %p26_p1 = scmp.eq.s32.totalorder %s25_s29, 0  ;;  %p36_p2 = scmp.eq.s32.totalorder %s790_s24, 0 }
   0x8   : > { %p128_p3 = scmp.eq.s32.totalorder %s861_s25, 1  ;;  %p133_p4 = scmp.ne.s32.totalorder %s782_s22, %s778_s21 }
   0x9   : > { %s877_s30 = scalar_select %p26_p1, %s786_s23, %s28_s28  }
   0xa   : > { %p879_p5 = por %p36_p2, %p35_p0  ;;  %p883_p6 = por %p128_p3, %p35_p0 }
   0xb   : > { %p134_p7 = scmp.eq.s32.totalorder %s595_s26, 1  ;;  %p596_p8 = scmp.ge.s32.totalorder %s790_s24, 1 }
   0xc   : > { %s1048_s7 = scalar_select %p879_p5, 1, 0 }
   0xd   : > { %s1049_s8 = scalar_select %p883_p6, 1, 0 }
   0xe   : > { %p183_p9 = scmp.lt.s32.totalorder %s790_s24, 3  ;;  %p890_p11 = por %p134_p7, %p133_p4 }
   0xf   : > { %p1045_p12 = scmp.eq.s32.totalorder %s861_s25, 0  ;;  %s792_s11 = smov [#allocation5]  }
  0x10   : > { %s1050_s9 = scalar_select %p890_p11, 1, 0 }
  0x11   : > { %p895_p13 = pnand %p596_p8, %p183_p9  ;;  %s195_s12 = sshll.u32 %s792_s11, 4  ;;  %s196_s12 = int_to_ptr.vmem [resolvable:$true] %s195_s12 }
  0x12   : > { %s696_s16 = scalar_lea.hbm %s1039_s1, 128 }
  0x13   : > { %s1051_s10 = scalar_select %p895_p13, 1, 0 }
  0x14   : > { %p633_p0 = pneg %p895_p13  ;;  %p697_p2 = scmp.ne.s32.totalorder %s1039_s1, %s696_s16 }
  0x15   : > { %p703_p8 = scmp.lt.u32.totalorder %s696_s16, %s1039_s1 }
  0x16   : > { %p903_p1 = pnand %p1045_p12, %p633_p0 }
  0x18   : > { %p698_p3 = pneg %p903_p1 }
  0x1a   : > { %p699_p4 = pnand %p698_p3, %p697_p2 }
  0x1c   : > { %p700_p7 = pneg %p699_p4 }
  0x1e   : > { %p705_p9 = pnand %p703_p8, %p700_p7 }
  0x20   : > { %708 = shalt.err (!%p705_p9)
}
  0x21   : > { %s709_s26 = scalar_lea.vmem %s196_s12, 128  ;;  %p717_p11 = scmp.lt.s32.totalorder %s196_s12, %s196_s12 }
  0x22   : > { %p710_p0 = scmp.ne.s32.totalorder %s196_s12, %s709_s26  ;;  %p718_p6 = scmp.lt.s32.totalorder %s709_s26, %s709_s26 }
  0x24   : > { %p712_p10 = pnand %p710_p0, %p698_p3  ;;  %p719_p13 = por %p718_p6, %p717_p11 }
  0x26   : > { %p713_p12 = pneg %p712_p10 }
  0x28   : > { %p720_p5 = pnand %p719_p13, %p713_p12 }
  0x2a   : > { %723 = shalt.err (!%p720_p5)
}
  0x2b   : > { %s793_s28 = smov 64   ;;  %s794_s29 = smov 4  }
  0x2c   : > { %636 = dma.hbm_to_vmem [thread:$0]  (!%p903_p1), %s1039_s1, 128, %s196_s12, [#allocation6], %s793_s28, %s793_s28, %s794_s29  }
  0x2d   : > { %p598_p2 = scmp.ge.s32.totalorder %s790_s24, 2 }
  0x2e   : > { %p1053_p10 = scmp.ne.s32.totalorder (!%p598_p2), %s1048_s7, 0 }
  0x2f   : > { %211 = sbr.rel (%p598_p2) target bundleno = 61 (0x3d), region = 28 }
  0x36   : > { %214 = sbr.rel (!%p1053_p10) target bundleno = 61 (0x3d), region = 32  ;;  %s216_s15 = sand.u32 (%p1053_p10), 1, %s786_s23  }
  0x37   : > { %s600_s16 = sshll.u32 (%p1053_p10), %s790_s24, 2  ;;  %s599_s17 = sshll.u32 (%p1053_p10), %s216_s15, 4 }
  0x38   : > { %s220_s13 = scalar_lea.vmem (%p1053_p10), %s1038_s0, %s600_s16  ;;  %s218_s12 = scalar_lea.vmem (%p1053_p10), [#allocation4], %s599_s17 }
  0x39   : > { %v236_v0 = vld [vmem:[%s220_s13] sm:$0xf] (%p1053_p10)  ;;  %v238_v1 = vld [vmem:[%s220_s13 + $0x8] sm:$0xf] (%p1053_p10)  ;;  %v240_v2 = vld [vmem:[%s220_s13 + $0x10] sm:$0xf] (%p1053_p10) }
  0x3a   : > { %237 = vst [vmem:[%s218_s12] sm:$0xf] (%p1053_p10), %v236_v0  ;;  %239 = vst [vmem:[%s218_s12 + $0x4] sm:$0xf] (%p1053_p10), %v238_v1  ;;  %v242_v3 = vld [vmem:[%s220_s13 + $0x18] sm:$0xf] (%p1053_p10) }
  0x3b   : > { %241 = vst [vmem:[%s218_s12 + $0x8] sm:$0xf] (%p1053_p10), %v240_v2  ;;  %243 = vst [vmem:[%s218_s12 + $0xc] sm:$0xf] (%p1053_p10), %v242_v3 }
  0x3d PF: > { %p1054_p5 = scmp.ne.s32.totalorder %s1051_s10, 0 }
  0x3e   : > { %s280_s7 = sand.u32 (!%p1054_p5), 1, %s782_s22   ;;  %p1055_p6 = scmp.eq.s32.totalorder (!%p1054_p5), %s861_s25, 0 }
  0x3f   : > { %277 = sbr.rel (%p1054_p5) target bundleno = 749 (0x2ed), region = 73  ;;  %s602_s20 = sshll.u32 (!%p1054_p5), %s280_s7, 4 }
  0x40   : > { %s282_s26 = scalar_lea.vmem (!%p1054_p5), [#allocation4], %s602_s20 }
  0x46   : > { %769 = dma.done.wait (%p1055_p6), [#allocation6], 128   ;;  %p1056_p11 = pmov %p1055_p6 }
  0x47   : > { %s942_s28 = scalar_lea.vmem [#allocation8], %s602_s20  ;;  %p1057_p12 = scmp.ne.s32.totalorder %s861_s25, 0 }
  0x48   : > { %771 = vsyncadd (%p1056_p11), [#allocation6], 4294967168  ;;  %vm318_vm0 = vcmask (!%p1057_p12), 7168   ;;  %v795_v4 = vmov (!%p1057_p12), 0.0  }
  0x49   : > { %317 = sbr.rel (%p1057_p12) target bundleno = 80 (0x50), region = 85  ;;  %319 = vst.msk [vmem:[#allocation2] sm:$0xff] (!%p1057_p12), %vm318_vm0, %v795_v4  ;;  %320 = vst.msk [vmem:[#allocation2 + $0x8] sm:$0xff] (!%p1057_p12), %vm318_vm0, %v795_v4 }
  0x4a   : > { %321 = vst.msk [vmem:[#allocation3] sm:$0xff] (!%p1057_p12), %vm318_vm0, %v795_v4  ;;  %322 = vst.msk [vmem:[#allocation3 + $0x8] sm:$0xff] (!%p1057_p12), %vm318_vm0, %v795_v4 }
  0x50 PF: > { %v689_v5 = vld [vmem:[%s282_s26] sm:$0xff]   ;;  %v796_v6 = vmov 0.0   ;;  %v690_v7 = vld [vmem:[%s282_s26 + $0x8] sm:$0xff]   ;;  %vm797_vm1 = vmmov 0   ;;  %v798_v9 = vmov 0   ;;  %vm358_vm2 = vcmask 261120  }
  0x51   : > { %619 = vmatprep.subr.bf16.mxu0 %v796_v6  ;;  %623 = vmatprep.mubr.msk.bf16.mxu0 %vm797_vm1, %v796_v6  ;;  %v329_v8 = vld [vmem:[%s1040_s2] sm:$0xff]  ;;  %v330_v11 = vld [vmem:[%s1040_s2 + $0x8] sm:$0xff]  ;;  %v407_v12 = vlaneseq  ;;  %s610_s15 = sshll.u32 %s861_s25, 7  ;;  %vm425_vm4 = vcmask 7168   ;;  %v428_v32 = vld [vmem:[#allocation3] sm:$0xff]  ;;  %p611_p13 = scmp.ne.s32.totalorder %s861_s25, 1 }
  0x52   : > { %620 = vmatpush3.bf16.msra.mxu0 %v689_v5  ;;  %688 = vset.pattern.permute.xlu0 %v798_v9  ;;  %v691_v10 = vld [vmem:[#allocation5] sm:$0xff]   ;;  %v410_v14 = vstv %s610_s15  ;;  %v418_v35 = vld [vmem:[#allocation2 + $0x8] sm:$0xff]  ;;  %v429_v39 = vld [vmem:[#allocation3 + $0x8] sm:$0xff]  ;;  %s799_s10 = smov (!%p611_p13), 1   ;;  %s800_s29 = smov (!%p611_p13), 127  }
  0x53   : > { %621 = vmatprep.subr.bf16.mxu0 %v796_v6  ;;  %333 = vperm.xlu0 %688, %v329_v8   ;;  %v408_v13 = vand.u32 127, %v407_v12  ;;  %v417_v30 = vld [vmem:[#allocation2] sm:$0xff]  ;;  %v459_v59 = vld [vmem:[%s1041_s3 + $0x8] sm:$0xff] (!%p611_p13) }
  0x54   : > { %v458_v58 = vld [vmem:[%s1041_s3] sm:$0xff] (!%p611_p13) }
  0x55   : > { %v411_v16 = vadd.s32 %v410_v14, %v408_v13 }
  0x56   : > { %622 = vmatpush3.bf16.msra.mxu0 %v690_v7 }
  0x57   : > { %338 = vperm.xlu0 %688, %v330_v11   ;;  %vm412_vm3 = vcmp.lt.s32.totalorder %v411_v16, 200 }
  0x59   : > { %624 = vmatmul.mubr.msk.bf16.vlgmr.msra.gmra.mrb[0].mxu0 %vm358_vm2, %v691_v10 }
  0xd2   : > { %v334_v15 = vpop.permute.xlu0 %333 }
  0xd6   : > { %v339_v20 = vpop.permute.xlu0 %338 }
 0x12c   : > { %v396_v17 = vpop.f32.mrb[0].mxu0 }
 0x12d   : > { %v397_v18 = vadd.f32 %v396_v17, %v334_v15  ;;  %v625_v19 = vpop.f32.mrb[1].mxu0 }
 0x12e   : > { %v399_v21 = vpop.f32.mrb[2].mxu0 }
 0x12f   : > { %v403_v22 = vmax.f32 %v397_v18, 0.0  ;;  %v400_v23 = vadd.f32 %v399_v21, %v339_v20  ;;  %v626_v24 = vpop.f32.mrb[3].mxu0 }
 0x131   : > { %405 = vst [vmem:[%s942_s28] sm:$0xff] %v403_v22  ;;  %v404_v25 = vmax.f32 %v400_v23, 0.0  ;;  %v415_v26 = vsel %vm412_vm3, %v403_v22, 0.0 }
 0x132   : > { %419 = vadd.xlane.f32.xlu1 %v415_v26  ;;  %v430_v27 = vmul.f32 %v415_v26, %v415_v26 }
 0x133   : > { %406 = vst [vmem:[%s942_s28 + $0x8] sm:$0xff] %v404_v25  ;;  %v416_v28 = vsel %vm412_vm3, %v404_v25, 0.0 }
 0x134   : > { %432 = vadd.xlane.f32.xlu0 %v430_v27  ;;  %v431_v29 = vmul.f32 %v416_v28, %v416_v28 }
 0x136   : > { %421 = vadd.xlane.f32.xlu1 %v416_v28 }
 0x13a   : > { %434 = vadd.xlane.f32.xlu1 %v431_v29 }
 0x1bf   : > { %v420_v31 = vpop.xlane.xlu1 %419 }
 0x1c0   : > { %v423_v33 = vadd.f32 %v420_v31, %v417_v30 }
 0x1c1   : > { %v433_v34 = vpop.xlane.xlu0 %432 }
 0x1c2   : > { %426 = vst.msk [vmem:[#allocation2] sm:$0xff] %vm425_vm4, %v423_v33  ;;  %v436_v36 = vadd.f32 %v433_v34, %v428_v32 }
 0x1c3   : > { %v422_v37 = vpop.xlane.xlu1 %421 }
 0x1c4   : > { %438 = vst.msk [vmem:[#allocation3] sm:$0xff] %vm425_vm4, %v436_v36  ;;  %v424_v38 = vadd.f32 %v422_v37, %v418_v35  ;;  %443 = sbr.rel (%p611_p13) target bundleno = 722 (0x2d2), region = 89 }
 0x1c6   : > { %427 = vst.msk [vmem:[#allocation2 + $0x8] sm:$0xff] %vm425_vm4, %v424_v38 }
 0x1c7   : > { %v435_v40 = vpop.xlane.xlu1 %434 }
 0x1c8   : > { %v437_v41 = vadd.f32 %v435_v40, %v429_v39 }
 0x1c9   : > { %v444_v42 = vld [vmem:[#allocation2] sm:$0xff] (!%p611_p13) }
 0x1ca   : > { %439 = vst.msk [vmem:[#allocation3 + $0x8] sm:$0xff] %vm425_vm4, %v437_v41  ;;  %v446_v44 = vmul.f32 (!%p611_p13), 0.005, %v444_v42 }
 0x1cb   : > { %v448_v43 = vld [vmem:[#allocation3] sm:$0xff] }
 0x1cc   : > { %v450_v45 = vmul.f32 0.005, %v448_v43  ;;  %v452_v50 = vmul.f32 %v446_v44, %v446_v44 }
 0x1cd   : > { %v445_v46 = vld [vmem:[#allocation2 + $0x8] sm:$0xff] }
 0x1ce   : > { %v447_v48 = vmul.f32 0.005, %v445_v46  ;;  %v454_v52 = vsub.f32 %v450_v45, %v452_v50 }
 0x1d0   : > { %v453_v51 = vmul.f32 %v447_v48, %v447_v48  ;;  %v456_v54 = vmax.f32 %v454_v52, 0.0 }
 0x1d1   : > { %v449_v47 = vld [vmem:[#allocation3 + $0x8] sm:$0xff] }
 0x1d2   : > { %v451_v49 = vmul.f32 0.005, %v449_v47  ;;  %v460_v56 = vadd.f32 1e-05, %v456_v54 }
 0x1d4   : > { %v455_v53 = vsub.f32 %v451_v49, %v453_v51  ;;  %692 = vrsqrt.f32 %v460_v56 }
 0x1d6   : > { %v457_v55 = vmax.f32 %v455_v53, 0.0 }
 0x1d8   : > { %v461_v57 = vadd.f32 1e-05, %v457_v55 }
 0x1da   : > { %694 = vrsqrt.f32 %v461_v57 }
 0x1de   : > { %v693_v60 = vpop.eup %692 }
 0x1df   : > { %v464_v62 = vmul.f32 %v693_v60, %v458_v58 }
 0x1e1   : > { %v468_v0 = vmul.f32 %v464_v62, %v446_v44  ;;  %466 = vst.msk [vmem:[%s1043_s5] sm:$0xff] %vm425_vm4, %v464_v62 }
 0x1e3   : > { %472 = vrot.lane.b32.xlu0 %v468_v0, %s799_s10 }
 0x1e4   : > { %v695_v61 = vpop.eup %694 }
 0x1e5   : > { %v465_v63 = vmul.f32 %v695_v61, %v459_v59 }
 0x1e7   : > { %467 = vst.msk [vmem:[%s1043_s5 + $0x8] sm:$0xff] %vm425_vm4, %v465_v63  ;;  %v469_v1 = vmul.f32 %v465_v63, %v447_v48 }
 0x1e9   : > { %474 = vrot.lane.b32.xlu0 %v469_v1, %s799_s10 }
 0x255   : > { %v473_v2 = vpop.permute.xlu0 %472 }
 0x256   : > { %v478_v3 = vsub.f32 %v458_v58, %v473_v2 }
 0x258   : > { %482 = vrot.lane.b32.xlu1 %v478_v3, %s800_s29 }
 0x25b   : > { %v475_v4 = vpop.permute.xlu0 %474 }
 0x25c   : > { %v479_v5 = vsub.f32 %v459_v59, %v475_v4 }
 0x25e   : > { %484 = vrot.lane.b32.xlu1 %v479_v5, %s800_s29 }
 0x2ca   : > { %v483_v6 = vpop.permute.xlu1 %482 }
 0x2cb   : > { %488 = vst.msk [vmem:[%s1044_s6] sm:$0xff] %vm425_vm4, %v483_v6 }
 0x2d0   : > { %v485_v7 = vpop.permute.xlu1 %484 }
 0x2d1   : > { %489 = vst.msk [vmem:[%s1044_s6 + $0x8] sm:$0xff] %vm425_vm4, %v485_v7 }
 0x2d2 PF: > { %s989_s13 = scalar_lea.hbm %s1042_s4, %s610_s15  ;;  %s503_s12 = sshll.u32 %s942_s28, 4  ;;  %s992_s12 = int_to_ptr.vmem [resolvable:$true] %s503_s12 }
 0x2d3   : > { %s996_s20 = scalar_lea.sflag [#allocation7], %s280_s7  ;;  %s724_s26 = scalar_lea.vmem %s992_s12, 256 }
 0x2d4   : > { %p725_p1 = scmp.ne.s32.totalorder %s992_s12, %s724_s26  ;;  %p1058_p3 = scmp.ne.s32.totalorder %s1049_s8, 0 }
 0x2d5   : > { %s801_s25 = smov [#allocation8]  }
 0x2d6   : > { %p726_p4 = pnand %p725_p1, %p1058_p3  ;;  %s728_s10 = sshll.u32 %s801_s25, 4  ;;  %s729_s10 = int_to_ptr.vmem [resolvable:$false] %s728_s10 }
 0x2d7   : > { %s730_s29 = scalar_lea.vmem %s729_s10, 512  ;;  %p731_p8 = scmp.lt.s32.totalorder %s992_s12, %s729_s10 }
 0x2d8   : > { %p727_p7 = pneg %p726_p4  ;;  %p732_p9 = scmp.lt.s32.totalorder %s730_s29, %s724_s26 }
 0x2da   : > { %p733_p0 = por %p732_p9, %p731_p8 }
 0x2dc   : > { %p734_p10 = pnand %p733_p0, %p727_p7 }
 0x2de   : > { %737 = shalt.err (!%p734_p10)
}
 0x2df   : > { %s738_s7 = scalar_lea.hbm %s989_s13, 256  ;;  %s742_s11 = scalar_lea.hbm %s1042_s4, 512 }
 0x2e0   : > { %p739_p5 = scmp.ne.s32.totalorder %s989_s13, %s738_s7  ;;  %p743_p12 = scmp.lt.u32.totalorder %s989_s13, %s1042_s4 }
 0x2e1   : > { %p744_p13 = scmp.lt.u32.totalorder %s742_s11, %s738_s7  ;;  %p746_p4 = scmp.lt.u32.totalorder %s738_s7, %s989_s13 }
 0x2e2   : > { %p740_p6 = pnand %p739_p5, %p1058_p3 }
 0x2e3   : > { %p745_p1 = por %p744_p13, %p743_p12 }
 0x2e4   : > { %p741_p11 = pneg %p740_p6 }
 0x2e5   : > { %p747_p7 = por %p746_p4, %p745_p1 }
 0x2e7   : > { %p748_p8 = pnand %p747_p7, %p741_p11 }
 0x2e9   : > { %751 = shalt.err (!%p748_p8)
}
 0x2ea   : > { %s802_s17 = smov 128   ;;  %s803_s18 = smov 256  }
 0x2eb   : > { %s804_s19 = smov 8  }
 0x2ec   : > { %631 = dma.vmem_to_hbm [thread:$0]  (%p1058_p3), %s992_s12, 256, %s989_s13, %s996_s20, %s802_s17, %s803_s18, %s804_s19  }
 0x2ed PF: > { %s530_s26 = sand.u32 1, %s778_s21   ;;  %p1059_p9 = scmp.ne.s32.totalorder %s1050_s9, 0 }
 0x2ee   : > { %s531_s25 = scalar_lea.sflag [#allocation7], %s530_s26 }
 0x2ef   : > { %p638_p0 = pnand %p598_p2, %p1059_p9 }
 0x2f1   : > { %773 = dma.done.wait (!%p638_p0), %s531_s25, 256  }
 0x2f2   : > { %775 = vsyncadd (!%p638_p0), %s531_s25, 4294967040  ;;  %p18_p10 = scmp.ge.s32.totalorder %s865_s27, 4   ;;  %s1060_s21 = smov %s782_s22 }
 0x2f3   : > { %s1061_s22 = smov %s786_s23  ;;  %s1062_s23 = smov %s877_s30 }
 0x2f4   : > { %s1063_s24 = smov %s865_s27  ;;  %20 = sbr.rel (!%p18_p10) target bundleno = 4 (0x4), region = 146 }
 0x2fb   :  { %536 = vsyncpa [#allocation6], 1 }
 0x2fc   :  { %538 = vsyncpa [#allocation6 + $0x1], 1 }
 0x2fd   :  { %539 = vsyncpa [#allocation7], 1 }
 0x2fe   :  { %541 = vsyncpa [#allocation7 + $0x1], 1 }

</bundles_post_ra>
